<compile_context>
chip_gen: v5e
topology: v5e:2x2
jax: 0.10.0
libtpu: 0.0.40
codegen_flags: <defaults>
</compile_context>

<pallas_src>
import functools

import jax
import jax.numpy as jnp
import numpy as np
from jax.experimental import pallas as pl
from jax.experimental.pallas import tpu as pltpu

NEG_SLOPE = 0.01  # nn.LeakyReLU default

_VMEM_SPEC = pl.BlockSpec(memory_space=pltpu.MemorySpace.VMEM)


# ---------------------------------------------------------------------------
# Fused Pallas kernel
# ---------------------------------------------------------------------------
def _textcnn_kernel(x_ref, wcat_ref, bcat_ref, wfc_ref, bfc_ref, o_ref, *,
                    B, L, windows, F):
    """Fused conv(all windows) + LeakyReLU + max-pool + concat + Linear.

    x_ref   : (B*L, E)        bf16 embedded tokens (batch*seq flattened)
    wcat_ref: (E, Kmax*W*F)   bf16 packed conv weights, tap-major groups,
                              zero-padded where tap k >= window size h
    bcat_ref: (1, W*F)        f32 conv biases (window-major)
    wfc_ref : (W*F, n_class)  bf16 fc weight
    bfc_ref : (1, n_class)    f32 fc bias
    o_ref   : (B, n_class)    f32 logits
    """
    BL = x_ref.shape[0]
    W = len(windows)
    Kmax = max(windows)
    WF = W * F

    # One MXU pass covering every window and every tap position.
    y = jnp.dot(x_ref[...], wcat_ref[...],
                preferred_element_type=jnp.float32)          # (B*L, Kmax*W*F)

    # Conv output at position t needs tap-k values computed at row t+k:
    # align with a sublane roll (XLU slot, free next to MXU/VPU) and add.
    # Wrapped rows are junk but lie outside the valid range masked below.
    acc = y[:, :WF]                                          # tap k = 0
    for k in range(1, Kmax):
        acc = acc + pltpu.roll(y[:, k * WF:(k + 1) * WF],
                               shift=BL - k, axis=0)         # result[i]=y[i+k]

    act = acc + bcat_ref[...]                                # conv bias (f32)
    act = jnp.where(act > 0, act, NEG_SLOPE * act)           # LeakyReLU (f32)
    act = act.reshape(B, L, WF)

    # Mask positions t >= L - h + 1 (per window) then max-pool over the
    # sequence axis; pooled (B, W*F) slab never leaves VMEM.
    t_idx = jax.lax.broadcasted_iota(jnp.int32, (B, L, WF), 1)
    c_idx = jax.lax.broadcasted_iota(jnp.int32, (B, L, WF), 2)
    thr = jnp.zeros((B, L, WF), jnp.int32)
    for wi, h in enumerate(windows):
        in_win = (c_idx >= wi * F) & (c_idx < (wi + 1) * F)
        thr = jnp.where(in_win, L - h + 1, thr)
    pooled = jnp.max(jnp.where(t_idx < thr, act, -jnp.inf), axis=1)  # (B, W*F)

    # Dropout(p=0.25) is identity in eval mode.
    # TODO(synk): train-mode stochastic dropout (pltpu.prng_*) not implemented.
    o_ref[...] = (jnp.dot(pooled, wfc_ref[...].astype(jnp.float32),
                          preferred_element_type=jnp.float32)
                  + bfc_ref[...])


# ---------------------------------------------------------------------------
# Forward pass (embedding gather + weight packing in JAX, one fused kernel)
# ---------------------------------------------------------------------------
def textcnn_forward(params, tokens, windows):
    # Embedding lookup (gather) — plain-JAX glue.  Could be folded into the
    # kernel via PrefetchScalarGridSpec row-gather if the table grows large.
    x = jnp.take(params["embed"], tokens, axis=0)            # (B, L, E) bf16
    B, L, E = x.shape
    F = params[f"conv_b_{windows[0]}"].shape[0]
    W = len(windows)
    Kmax = max(windows)
    n_class = params["fc_b"].shape[0]

    # Pack every window/tap into one (E, Kmax*W*F) matrix, tap-major groups,
    # zero-padded for taps k >= h (so the kernel issues a single matmul).
    w_cat = jnp.zeros((E, Kmax, W, F), params["embed"].dtype)
    for wi, h in enumerate(windows):
        w_cat = w_cat.at[:, :h, wi, :].set(
            jnp.transpose(params[f"conv_w_{h}"], (1, 0, 2)))  # (E, h, F)
    w_cat = w_cat.reshape(E, Kmax * W * F)
    b_cat = jnp.concatenate(
        [params[f"conv_b_{h}"] for h in windows]).reshape(1, W * F)

    kernel = functools.partial(_textcnn_kernel, B=B, L=L,
                               windows=tuple(windows), F=F)
    return pl.pallas_call(
        kernel,
        out_shape=jax.ShapeDtypeStruct((B, n_class), jnp.float32),
        in_specs=[_VMEM_SPEC] * 5,
        out_specs=_VMEM_SPEC,
        # Single invocation (whole problem fits in a few KB of VMEM); on v7x a
        # batch grid axis with dimension_semantics=("parallel",) would be added
        # once the batch is non-trivial.
    )(x.reshape(B * L, E), w_cat, b_cat,
      params["fc_w"], params["fc_b"].reshape(1, n_class))


# ---------------------------------------------------------------------------
# Pure-JAX f32 reference for the correctness check
# ---------------------------------------------------------------------------
def textcnn_reference(params, tokens, windows):
    x = jnp.take(params["embed"], tokens, axis=0).astype(jnp.float32)
    B, L, E = x.shape
    outs = []
    for h in windows:
        w = params[f"conv_w_{h}"].astype(jnp.float32)        # (h, E, F)
        b = params[f"conv_b_{h}"].astype(jnp.float32)
        L_out = L - h + 1
        acc = jnp.zeros((B, L_out, w.shape[2]), jnp.float32)
        for k in range(h):
            acc = acc + jnp.einsum("ble,ef->blf", x[:, k:k + L_out, :], w[k])
        acc = acc + b[None, None, :]
        acc = jnp.where(acc > 0, acc, NEG_SLOPE * acc)
        outs.append(jnp.max(acc, axis=1))
    feat = jnp.concatenate(outs, axis=1)
    return feat @ params["fc_w"].astype(jnp.float32) + params["fc_b"][None, :]


# ---------------------------------------------------------------------------
if __name__ == "__main__":
    vocab_size = 50
    embedding_dim = 32
    feature_size = 16
    windows = (2, 3, 4)
    max_len = 16
    n_class = 8
    batch = 2

    key = jax.random.PRNGKey(0)
    keys = jax.random.split(key, 3 + 2 * len(windows))

    params = {
        "embed": (0.1 * jax.random.normal(
            keys[0], (vocab_size, embedding_dim), jnp.float32)
        ).astype(jnp.bfloat16),
        "fc_w": (0.1 * jax.random.normal(
            keys[1], (feature_size * len(windows), n_class), jnp.float32)
        ).astype(jnp.bfloat16),
        "fc_b": 0.1 * jax.random.normal(keys[2], (n_class,), jnp.float32),
    }
    for i, h in enumerate(windows):
        params[f"conv_w_{h}"] = (0.1 * jax.random.normal(
            keys[3 + 2 * i], (h, embedding_dim, feature_size), jnp.float32)
        ).astype(jnp.bfloat16)
        params[f"conv_b_{h}"] = 0.1 * jax.random.normal(
            keys[4 + 2 * i], (feature_size,), jnp.float32)

    tokens = jax.random.randint(
        jax.random.PRNGKey(42), (batch, max_len), 0, vocab_size, jnp.int32)

    fwd = jax.jit(functools.partial(textcnn_forward, windows=windows))
    out = jax.block_until_ready(fwd(params, tokens))

    ref = jax.block_until_ready(textcnn_reference(params, tokens, windows))
    # bf16 MXU inputs (params stored in bf16) -> loosened tolerance.
    np.testing.assert_allclose(np.asarray(out, np.float32), np.asarray(ref),
                               rtol=2e-2, atol=2e-2)
    assert out.shape == (batch, n_class)
    print("KERNEL_OK")
</pallas_src>

<mosaic_0001>
module attributes {stable_mosaic.version = 11 : i64} {
  func.func @_textcnn_kernel(%arg0: memref<32x32xbf16, #tpu.memory_space<vmem>>, %arg1: memref<32x192xbf16, #tpu.memory_space<vmem>>, %arg2: memref<1x48xf32, #tpu.memory_space<vmem>>, %arg3: memref<48x8xbf16, #tpu.memory_space<vmem>>, %arg4: memref<1x8xf32, #tpu.memory_space<vmem>>, %arg5: memref<2x8xf32, #tpu.memory_space<vmem>>) attributes {dimension_semantics = [], scalar_prefetch = 0 : i64, scratch_operands = 0 : i64, tpu.core_type = #tpu.core_type<tc>} {
    %c0 = arith.constant 0 : index
    %c0_0 = arith.constant 0 : index
    %0 = vector.load %arg0[%c0, %c0_0] : memref<32x32xbf16, #tpu.memory_space<vmem>>, vector<32x32xbf16>
    %c0_1 = arith.constant 0 : index
    %c0_2 = arith.constant 0 : index
    %1 = vector.load %arg1[%c0_1, %c0_2] : memref<32x192xbf16, #tpu.memory_space<vmem>>, vector<32x192xbf16>
    %cst = arith.constant dense<0.000000e+00> : vector<32x192xf32>
    %2 = tpu.matmul %0, %1, %cst {dimension_numbers = #tpu.dot_dimension_numbers<[1], [0], [0], [1], [0, 0, 1, 1], [], []>} : vector<32x32xbf16>, vector<32x192xbf16>, vector<32x192xf32> -> vector<32x192xf32>
    %3 = vector.extract_strided_slice %2 {offsets = [0, 0], sizes = [32, 48], strides = [1, 1]} : vector<32x192xf32> to vector<32x48xf32>
    %4 = vector.extract_strided_slice %2 {offsets = [0, 48], sizes = [32, 48], strides = [1, 1]} : vector<32x192xf32> to vector<32x48xf32>
    %c31_i32 = arith.constant 31 : i32
    %5 = tpu.dynamic_rotate %4 by %c31_i32 dim 0 : vector<32x48xf32>, i32 -> vector<32x48xf32>
    %6 = arith.addf %3, %5 : vector<32x48xf32>
    %7 = vector.extract_strided_slice %2 {offsets = [0, 96], sizes = [32, 48], strides = [1, 1]} : vector<32x192xf32> to vector<32x48xf32>
    %c30_i32 = arith.constant 30 : i32
    %8 = tpu.dynamic_rotate %7 by %c30_i32 dim 0 : vector<32x48xf32>, i32 -> vector<32x48xf32>
    %9 = arith.addf %6, %8 : vector<32x48xf32>
    %10 = vector.extract_strided_slice %2 {offsets = [0, 144], sizes = [32, 48], strides = [1, 1]} : vector<32x192xf32> to vector<32x48xf32>
    %c29_i32 = arith.constant 29 : i32
    %11 = tpu.dynamic_rotate %10 by %c29_i32 dim 0 : vector<32x48xf32>, i32 -> vector<32x48xf32>
    %12 = arith.addf %9, %11 : vector<32x48xf32>
    %c0_3 = arith.constant 0 : index
    %c0_4 = arith.constant 0 : index
    %13 = vector.load %arg2[%c0_3, %c0_4] : memref<1x48xf32, #tpu.memory_space<vmem>>, vector<1x48xf32>
    %14 = vector.broadcast %13 : vector<1x48xf32> to vector<32x48xf32>
    %15 = arith.addf %12, %14 : vector<32x48xf32>
    %cst_5 = arith.constant 0.000000e+00 : f32
    %16 = vector.broadcast %cst_5 : f32 to vector<32x48xf32>
    %17 = arith.cmpf ogt, %15, %16 : vector<32x48xf32>
    %cst_6 = arith.constant 0.00999999977 : f32
    %18 = vector.broadcast %cst_6 : f32 to vector<32x48xf32>
    %19 = arith.mulf %18, %15 : vector<32x48xf32>
    %20 = arith.select %17, %15, %19 : vector<32x48xi1>, vector<32x48xf32>
    %21 = vector.shape_cast %20 : vector<32x48xf32> to vector<2x16x48xf32>
    %22 = tpu.iota {dimensions = array<i32: 1>} : vector<2x16x48xi32>
    %23 = tpu.iota {dimensions = array<i32: 2>} : vector<2x16x48xi32>
    %c0_i32 = arith.constant 0 : i32
    %24 = vector.broadcast %c0_i32 : i32 to vector<2x16x48xi32>
    %c0_i32_7 = arith.constant 0 : i32
    %25 = vector.broadcast %c0_i32_7 : i32 to vector<2x16x48xi32>
    %26 = arith.cmpi sge, %23, %25 : vector<2x16x48xi32>
    %c16_i32 = arith.constant 16 : i32
    %27 = vector.broadcast %c16_i32 : i32 to vector<2x16x48xi32>
    %28 = arith.cmpi slt, %23, %27 : vector<2x16x48xi32>
    %29 = arith.andi %26, %28 : vector<2x16x48xi1>
    %c15_i32 = arith.constant 15 : i32
    %30 = vector.broadcast %c15_i32 : i32 to vector<2x16x48xi32>
    %31 = arith.select %29, %30, %24 : vector<2x16x48xi1>, vector<2x16x48xi32>
    %c16_i32_8 = arith.constant 16 : i32
    %32 = vector.broadcast %c16_i32_8 : i32 to vector<2x16x48xi32>
    %33 = arith.cmpi sge, %23, %32 : vector<2x16x48xi32>
    %c32_i32 = arith.constant 32 : i32
    %34 = vector.broadcast %c32_i32 : i32 to vector<2x16x48xi32>
    %35 = arith.cmpi slt, %23, %34 : vector<2x16x48xi32>
    %36 = arith.andi %33, %35 : vector<2x16x48xi1>
    %c14_i32 = arith.constant 14 : i32
    %37 = vector.broadcast %c14_i32 : i32 to vector<2x16x48xi32>
    %38 = arith.select %36, %37, %31 : vector<2x16x48xi1>, vector<2x16x48xi32>
    %c32_i32_9 = arith.constant 32 : i32
    %39 = vector.broadcast %c32_i32_9 : i32 to vector<2x16x48xi32>
    %40 = arith.cmpi sge, %23, %39 : vector<2x16x48xi32>
    %c48_i32 = arith.constant 48 : i32
    %41 = vector.broadcast %c48_i32 : i32 to vector<2x16x48xi32>
    %42 = arith.cmpi slt, %23, %41 : vector<2x16x48xi32>
    %43 = arith.andi %40, %42 : vector<2x16x48xi1>
    %c13_i32 = arith.constant 13 : i32
    %44 = vector.broadcast %c13_i32 : i32 to vector<2x16x48xi32>
    %45 = arith.select %43, %44, %38 : vector<2x16x48xi1>, vector<2x16x48xi32>
    %46 = arith.cmpi slt, %22, %45 : vector<2x16x48xi32>
    %cst_10 = arith.constant 0xFF800000 : f32
    %47 = vector.broadcast %cst_10 : f32 to vector<2x16x48xf32>
    %48 = arith.select %46, %21, %47 : vector<2x16x48xi1>, vector<2x16x48xf32>
    %cst_11 = arith.constant dense<0xFF800000> : vector<2x48xf32>
    %49 = vector.multi_reduction <maximumf>, %48, %cst_11 [1] : vector<2x16x48xf32> to vector<2x48xf32>
    %c0_12 = arith.constant 0 : index
    %c0_13 = arith.constant 0 : index
    %50 = vector.load %arg3[%c0_12, %c0_13] : memref<48x8xbf16, #tpu.memory_space<vmem>>, vector<48x8xbf16>
    %51 = arith.extf %50 : vector<48x8xbf16> to vector<48x8xf32>
    %cst_14 = arith.constant dense<0.000000e+00> : vector<2x8xf32>
    %52 = tpu.matmul %49, %51, %cst_14 {dimension_numbers = #tpu.dot_dimension_numbers<[1], [0], [0], [1], [0, 0, 1, 1], [], []>} : vector<2x48xf32>, vector<48x8xf32>, vector<2x8xf32> -> vector<2x8xf32>
    %c0_15 = arith.constant 0 : index
    %c0_16 = arith.constant 0 : index
    %53 = vector.load %arg4[%c0_15, %c0_16] : memref<1x8xf32, #tpu.memory_space<vmem>>, vector<1x8xf32>
    %54 = vector.broadcast %53 : vector<1x8xf32> to vector<2x8xf32>
    %55 = arith.addf %52, %54 : vector<2x8xf32>
    %c0_17 = arith.constant 0 : index
    %c0_18 = arith.constant 0 : index
    %56 = vector.load %arg5[%c0_17, %c0_18] : memref<2x8xf32, #tpu.memory_space<vmem>>, vector<2x8xf32>
    tpu.vector_store %arg5[%c0_17, %c0_18], %55 {strides = array<i32>} : memref<2x8xf32, #tpu.memory_space<vmem>>, vector<2x8xf32>,
    return
  }
}

</mosaic_0001>

<bundles_post_ra>
// kernel: textcnn_forward.1
= control target key start
LH: loop header
LB: loop body
LE: loop exit
PB: predicated region body
PF: predicated region fallthrough
CT: control target
= control target key end

     0   :  { %s566_s0 = inlined_call_operand.vmem [shape: bf16[32,32], index: 0, kind: input, shape index: {}]   ;;  %s567_s1 = inlined_call_operand.vmem [shape: bf16[32,192], index: 1, kind: input, shape index: {}]   ;;  %s568_s2 = inlined_call_operand.vmem [shape: f32[1,48], index: 2, kind: input, shape index: {}]   ;;  %s569_s3 = inlined_call_operand.vmem [shape: bf16[48,8], index: 3, kind: input, shape index: {}]   ;;  %s570_s4 = inlined_call_operand.vmem [shape: f32[1,8], index: 4, kind: input, shape index: {}]   ;;  %s571_s5 = inlined_call_operand.hbm [shape: f32[2,8], index: 5, kind: output, shape index: {}]  }
   0x1   :  { %v340_v0 = vld [vmem:[%s567_s1 + $0x10] sm:$0xf]  ;;  %v356_v1 = vld [vmem:[%s567_s1 + $0x14] sm:$0xf0]  ;;  %v355_v2 = vld [vmem:[%s567_s1 + $0x14] sm:$0xf] }
   0x2   :  { %v341_v3 = vor.u32 %v356_v1, %v340_v0  ;;  %v342_v4 = vld [vmem:[%s567_s1 + $0x18] sm:$0xf0]  ;;  %v332_v5 = vld [vmem:[%s567_s1] sm:$0xf]  ;;  %v354_v6 = vld [vmem:[%s567_s1 + $0x4] sm:$0xf0] }
   0x3   :  { %v345_v7 = vor.u32 %v355_v2, %v342_v4  ;;  %v353_v8 = vld [vmem:[%s567_s1 + $0x4] sm:$0xf]  ;;  %v334_v9 = vld [vmem:[%s567_s1 + $0x8] sm:$0xf0]  ;;  %v333_v10 = vor.u32 %v354_v6, %v332_v5 }
   0x4   :  { %73 = vmatpush.bf16.msra.mxu0 %v341_v3  ;;  %371 = vmatpush.bf16.msra.mxu3 %v341_v3  ;;  %v337_v11 = vor.u32 %v353_v8, %v334_v9 }
   0x5   :  { %92 = vmatpush.bf16.msra.mxu1 %v345_v7  ;;  %373 = vmatpush.bf16.msra.mxu2 %v345_v7 }
   0x6   :  { %10 = vsyncpa [#allocation3], 0  ;;  %v351_v12 = vld [vmem:[%s566_s0] sm:$0xff]  ;;  %v352_v13 = vld [vmem:[%s566_s0 + $0x8] sm:$0xff]  ;;  %vm60_vm0 = vcmask 261120   ;;  %s408_s1 = smov 32   ;;  %v125_v35 = vlaneseq }
   0x7   :  { %s409_s13 = smov 80   ;;  %s410_s0 = smov 112   ;;  %v370_v30 = vld [vmem:[%s569_s3 + $0x10] sm:$0xff]   ;;  %v369_v31 = vld [vmem:[%s569_s3 + $0x8] sm:$0xff]   ;;  %v358_v39 = vld [vmem:[%s569_s3] sm:$0xff]   ;;  %v411_v57 = vmov 0  }
   0x8   :  { %74 = vmatpush.bf16.msra.mxu0 %v333_v10  ;;  %372 = vmatpush.bf16.msra.mxu3 %v333_v10  ;;  %v368_v33 = vunpack.c.h.bf16 %v370_v30  ;;  %v367_v34 = vunpack.c.l.bf16 %v370_v30  ;;  %v364_v37 = vunpack.c.h.bf16 %v369_v31  ;;  %v363_v40 = vunpack.c.l.bf16 %v369_v31  ;;  %s412_s22 = smov [#allocation2]   ;;  %s313_s26 = sshll.u32 %s571_s5, 4  ;;  %s314_s26 = int_to_ptr.hbm [resolvable:$true] %s313_s26 }
   0x9   :  { %93 = vmatpush.bf16.msra.mxu1 %v337_v11  ;;  %374 = vmatpush.bf16.msra.mxu2 %v337_v11  ;;  %v505_v42 = vshrl.u32 %v125_v35, 7  ;;  %v224_v43 = vand.u32 127, %v125_v35  ;;  %v360_v44 = vunpack.c.h.bf16 %v358_v39  ;;  %v359_v47 = vunpack.c.l.bf16 %v358_v39  ;;  %s311_s23 = sshll.u32 %s412_s22, 4  ;;  %s312_s23 = int_to_ptr.vmem [resolvable:$true] %s311_s23 }
   0xa   :  { %vm243_vm15 = vcmask 392192  }
   0xb   :  { %346 = vmatmul.msk.bf16.vlgmr.msra.gmra.mxu0 %vm60_vm0, %v351_v12  ;;  %347 = vmatmul.msk.bf16.vlgmr.msra.gmra.mxu3 %vm60_vm0, %v352_v13  ;;  %vm127_vm1 = vcmp.lt.s32.totalorder %v505_v42, 7  ;;  %vm226_vm2 = vcmp.lt.s32.totalorder %v224_v43, 16  ;;  %vm229_vm3 = vcmp.ge.s32.totalorder %v224_v43, 16  ;;  %vm230_vm4 = vcmp.lt.s32.totalorder %v224_v43, 32 }
   0xc   :  { %348 = vmatmul.msk.bf16.vlgmr.msra.gmra.mxu1 %vm60_vm0, %v351_v12  ;;  %349 = vmatmul.msk.bf16.vlgmr.msra.gmra.mxu2 %vm60_vm0, %v352_v13  ;;  %v228_v58 = vsel %vm226_vm2, 15, %v411_v57  ;;  %vm233_vm5 = vcmp.ge.s32.totalorder %v224_v43, 32  ;;  %vm234_vm6 = vcmp.lt.s32.totalorder %v224_v43, 48  ;;  %vm517_vm7 = vmand %vm229_vm3, %vm230_vm4  ;;  %vm168_vm8 = vcmp.lt.s32.totalorder %v505_v42, 6 }
   0xd   :  { %294 = vmatpush.msrb.mxu2 %v368_v33  ;;  %vm193_vm9 = vcmp.lt.s32.totalorder %v505_v42, 5  ;;  %v222_v1 = vadd.s32 8, %v505_v42  ;;  %v232_v9 = vsel %vm517_vm7, 14, %v228_v58  ;;  %vm235_vm10 = vmand %vm233_vm5, %vm234_vm6  ;;  %vm280_vm2 = vcmask 1041409  }
   0xe   :  { %vm304_vm3 = vcmask 58368  }
   0xf   :  { %295 = vmatpush.msrb.mxu2 %v367_v34 }
  0x11   :  { %296 = vmatpush.msrb.mxu2 %v364_v37 }
  0x13   :  { %297 = vmatpush.msrb.mxu2 %v363_v40 }
  0x15   :  { %298 = vmatpush.msrb.mxu2 %v360_v44 }
  0x17   :  { %299 = vmatpush.msrb.mxu2 %v359_v47 }
  0x88   :  { %v477_v14 = vpop.f32.mrf.mxu0 }
  0x89   :  { %140 = vrot.lane.b32.xlu2 %v477_v14, %s408_s1  ;;  %109 = vrot.lane.b32.xlu0 %v477_v14, %s409_s13  ;;  %v95_v15 = vpop.f32.mrf.mxu1 }
  0x8e   :  { %v481_v16 = vpop.f32.mrf.mxu3 }
  0x8f   :  { %113 = vrot.lane.b32.xlu1 %v481_v16, %s409_s13  ;;  %v100_v18 = vpop.f32.mrf.mxu2 }
  0x90   :  { %v488_v20 = vpop.f32.mrf.mxu0 }
  0x91   :  { %142 = vrot.lane.b32.xlu2 %v95_v15, %s408_s1  ;;  %177 = vrot.lane.b32.xlu0 %v95_v15, %s410_s0  ;;  %v97_v17 = vpop.f32.mrf.mxu1 }
  0x96   :  { %v485_v19 = vpop.f32.mrf.mxu3 }
  0x97   :  { %146 = vrot.lane.b32.xlu1 %v97_v17, %s408_s1  ;;  %v102_v21 = vpop.f32.mrf.mxu2 }
  0x99   :  { %148 = vrot.lane.b32.xlu2 %v481_v16, %s408_s1  ;;  %150 = vrot.lane.b32.xlu0 %v100_v18, %s408_s1 }
  0x9f   :  { %115 = vrot.lane.b32.xlu1 %v485_v19, %s409_s13 }
  0xa1   :  { %154 = vrot.lane.b32.xlu2 %v102_v21, %s408_s1  ;;  %111 = vrot.lane.b32.xlu0 %v488_v20, %s409_s13 }
  0xa7   :  { %152 = vrot.lane.b32.xlu1 %v485_v19, %s408_s1 }
  0xa9   :  { %181 = vrot.lane.b32.xlu2 %v100_v18, %s410_s0  ;;  %144 = vrot.lane.b32.xlu0 %v488_v20, %s408_s1 }
  0xaf   :  { %179 = vrot.lane.b32.xlu1 %v97_v17, %s410_s0 }
  0xb1   :  { %183 = vrot.lane.b32.xlu0 %v102_v21, %s410_s0 }
  0xe3   :  { %v141_v22 = vpop.permute.xlu2 %140 }
  0xeb   :  { %v143_v24 = vpop.permute.xlu2 %142 }
  0xec   :  { %v156_v41 = vsel %vm60_vm0, %v141_v22, %v143_v24 }
  0xed   :  { %v164_v45 = vrot.slane %v156_v41, 2 }
  0xf3   :  { %v149_v28 = vpop.permute.xlu2 %148 }
  0xfb   :  { %v110_v23 = vpop.permute.xlu0 %109  ;;  %v155_v38 = vpop.permute.xlu2 %154 }
  0xfc   :  { %v121_v52 = vrot.slane %v110_v23, 1  ;;  %v236_v23 = vsel %vm235_vm10, 13, %v232_v9 }
  0xfd   :  { %vm237_vm11 = vcmp.lt.s32.totalorder %v505_v42, %v236_v23  ;;  %vm238_vm12 = vcmp.lt.s32.totalorder %v222_v1, %v236_v23 }
 0x101   :  { %v114_v25 = vpop.permute.xlu1 %113 }
 0x102   :  { %v123_v53 = vrot.slane %v114_v25, 1 }
 0x103   :  { %v493_v26 = vpop.permute.xlu0 %177  ;;  %v182_v59 = vpop.permute.xlu2 %181 }
 0x104   :  { %v191_v6 = vrot.slane %v182_v59, 3  ;;  %v189_v11 = vrot.slane %v493_v26, 3 }
 0x109   :  { %v147_v27 = vpop.permute.xlu1 %146 }
 0x10b   :  { %v151_v29 = vpop.permute.xlu0 %150 }
 0x10c   :  { %v158_v49 = vsel %vm60_vm0, %v149_v28, %v151_v29 }
 0x10d   :  { %v166_v60 = vrot.slane %v158_v49, 2 }
 0x111   :  { %v116_v32 = vpop.permute.xlu1 %115 }
 0x112   :  { %v124_v54 = vrot.slane %v116_v32, 1 }
 0x113   :  { %v112_v36 = vpop.permute.xlu0 %111 }
 0x114   :  { %v122_v48 = vrot.slane %v112_v36, 1  ;;  %v128_v2 = vsel %vm127_vm1, %v123_v53, %v124_v54  ;;  %v131_v3 = vsel %vm127_vm1, %v124_v54, %v121_v52 }
 0x115   :  { %v134_v17 = vadd.f32 %v128_v2, %v481_v16  ;;  %v135_v18 = vadd.f32 %v131_v3, %v485_v19 }
 0x116   :  { %v129_v61 = vsel %vm127_vm1, %v122_v48, %v123_v53  ;;  %v130_v62 = vsel %vm127_vm1, %v121_v52, %v122_v48 }
 0x117   :  { %v132_v7 = vadd.f32 %v130_v62, %v477_v14  ;;  %v133_v8 = vadd.f32 %v129_v61, %v488_v20  ;;  %v380_v14 = vld [vmem:[%s568_s2] ss:$0 sm:$0xff] }
 0x119   :  { %v153_v46 = vpop.permute.xlu1 %152 }
 0x11a   :  { %v159_v50 = vsel %vm60_vm0, %v153_v46, %v155_v38 }
 0x11b   :  { %v145_v51 = vpop.permute.xlu0 %144  ;;  %v167_v63 = vrot.slane %v159_v50, 2 }
 0x11c   :  { %v157_v55 = vsel %vm60_vm0, %v145_v51, %v147_v27 }
 0x11d   :  { %v165_v56 = vrot.slane %v157_v55, 2  ;;  %v169_v12 = vsel %vm168_vm8, %v166_v60, %v167_v63  ;;  %v172_v13 = vsel %vm168_vm8, %v167_v63, %v164_v45 }
 0x11e   :  { %v175_v16 = vadd.f32 %v169_v12, %v134_v17  ;;  %v176_v29 = vadd.f32 %v172_v13, %v135_v18 }
 0x11f   :  { %v170_v4 = vsel %vm168_vm8, %v165_v56, %v166_v60  ;;  %v171_v5 = vsel %vm168_vm8, %v164_v45, %v165_v56 }
 0x120   :  { %v173_v20 = vadd.f32 %v171_v5, %v132_v7  ;;  %v174_v21 = vadd.f32 %v170_v4, %v133_v8  ;;  %v381_v4 = vld [vmem:[%s570_s4] ss:$0 sm:$0xff] }
 0x121   :  { %v180_v10 = vpop.permute.xlu1 %179 }
 0x122   :  { %v190_v15 = vrot.slane %v180_v10, 3 }
 0x123   :  { %v184_v22 = vpop.permute.xlu0 %183 }
 0x124   :  { %v195_v24 = vsel %vm193_vm9, %v190_v15, %v191_v6  ;;  %v196_v25 = vsel %vm193_vm9, %v189_v11, %v190_v15  ;;  %v192_v26 = vrot.slane %v184_v22, 3 }
 0x125   :  { %v198_v27 = vadd.f32 %v196_v25, %v173_v20  ;;  %v199_v28 = vadd.f32 %v195_v24, %v174_v21 }
 0x126   :  { %v194_v19 = vsel %vm193_vm9, %v191_v6, %v192_v26  ;;  %v197_v30 = vsel %vm193_vm9, %v192_v26, %v189_v11 }
 0x127   :  { %v206_v31 = vadd.f32 %v380_v14, %v198_v27  ;;  %v207_v32 = vadd.f32 %v380_v14, %v199_v28  ;;  %v200_v33 = vadd.f32 %v194_v19, %v175_v16  ;;  %v201_v34 = vadd.f32 %v197_v30, %v176_v29 }
 0x129   :  { %vm210_vm13 = vcmp.gt.f32.partialorder %v206_v31, 0.0  ;;  %vm211_vm14 = vcmp.gt.f32.partialorder %v207_v32, 0.0  ;;  %v214_v35 = vmul.f32 0.01, %v206_v31  ;;  %v215_v36 = vmul.f32 0.01, %v207_v32 }
 0x12a   :  { %v208_v37 = vadd.f32 %v380_v14, %v200_v33  ;;  %v209_v38 = vadd.f32 %v380_v14, %v201_v34 }
 0x12b   :  { %v218_v39 = vsel %vm210_vm13, %v206_v31, %v214_v35  ;;  %v219_v40 = vsel %vm211_vm14, %v207_v32, %v215_v36 }
 0x12c   :  { %v239_v41 = vsel %vm237_vm11, %v218_v39, -inf  ;;  %v240_v43 = vsel %vm238_vm12, %v219_v40, -inf  ;;  %vm212_vm0 = vcmp.gt.f32.partialorder %v208_v37, 0.0  ;;  %vm213_vm1 = vcmp.gt.f32.partialorder %v209_v38, 0.0 }
 0x12d   :  { %v216_v44 = vmul.f32 0.01, %v208_v37  ;;  %v217_v45 = vmul.f32 0.01, %v209_v38  ;;  %v244_v46 = vsel %vm243_vm15, %v239_v41, -inf  ;;  %v245_v47 = vsel %vm243_vm15, %v240_v43, -inf }
 0x12e   :  { %v246_v48 = vmax.f32 %v244_v46, %v245_v47 }
 0x12f   :  { %v220_v49 = vsel %vm212_vm0, %v208_v37, %v216_v44  ;;  %v221_v50 = vsel %vm213_vm1, %v209_v38, %v217_v45 }
 0x130   :  { %v241_v51 = vsel %vm237_vm11, %v220_v49, -inf  ;;  %v242_v52 = vsel %vm238_vm12, %v221_v50, -inf  ;;  %v247_v53 = vrot.slane %v246_v48, 4 }
 0x131   :  { %v253_v54 = vsel %vm243_vm15, %v241_v51, -inf  ;;  %v254_v55 = vsel %vm243_vm15, %v242_v52, -inf }
 0x132   :  { %v248_v56 = vmax.f32 %v246_v48, %v247_v53  ;;  %v255_v57 = vmax.f32 %v253_v54, %v254_v55 }
 0x134   :  { %v249_v58 = vrot.slane %v248_v56, 2  ;;  %v256_v59 = vrot.slane %v255_v57, 4 }
 0x136   :  { %v250_v60 = vmax.f32 %v248_v56, %v249_v58  ;;  %v257_v61 = vmax.f32 %v255_v57, %v256_v59 }
 0x138   :  { %v258_v62 = vrot.slane %v257_v61, 2  ;;  %v251_v63 = vrot.slane %v250_v60, 1 }
 0x13a   :  { %v259_v0 = vmax.f32 %v257_v61, %v258_v62  ;;  %v252_v42 = vmax.f32 %v250_v60, %v251_v63 }
 0x13c   :  { %v260_v2 = vrot.slane %v259_v0, 1 }
 0x13e   :  { %v261_v3 = vmax.f32 %v259_v0, %v260_v2 }
 0x140   :  { %v281_v1 = vsel %vm280_vm2, %v261_v3, %v252_v42 }
 0x141   :  { %350 = vmatmul.msk.f32.vlgmr.msrb.gmra.mxu2 %vm243_vm15, %v281_v1 }
 0x1c4   :  { %v301_v5 = vpop.f32.mrf.mxu2 }
 0x1c5   :  { %v302_v6 = vadd.f32 %v381_v4, %v301_v5 }
 0x1c7   :  { %305 = vst.msk [vmem:[#allocation2] sm:$0x3] %vm304_vm3, %v302_v6 }
 0x1c8   :  { %316 = dma.vmem_to_hbm [thread:$0]  %s312_s23, 32, %s314_s26, [#allocation3]  }
 0x1c9   :  { %406 = dma.done.wait [#allocation3], 32  }
 0x1ca   :  { %407 = vsyncadd [#allocation3], 4294967264 }
 0x1cb   :  { %321 = vsyncpa [#allocation3], 1 }

</bundles_post_ra>
